<compile_context>
chip_gen: v7x
topology: tpu7x:2x2x1
jax: 0.10.0
libtpu: 0.0.40
codegen_flags: <defaults>
</compile_context>

<pallas_src>
import functools
import math

import jax
import jax.numpy as jnp
from jax import lax
from jax.experimental import pallas as pl
from jax.experimental.pallas import tpu as pltpu


# ---------------------------------------------------------------------------
# Kernels
# ---------------------------------------------------------------------------
def _linear_kernel(x_ref, w_ref, b_ref, o_ref):
    acc = jnp.dot(x_ref[...], w_ref[...], preferred_element_type=jnp.float32)
    o_ref[...] = (acc + b_ref[...]).astype(o_ref.dtype)


def _gelu_linear_kernel(x_ref, w_ref, b_ref, o_ref):
    # NOTE: tanh-approx GELU (torch default is exact erf GELU; difference is tiny).
    # GELU is computed in f32 (VPU/EUP), only the matmul operands are bf16.
    xg = jax.nn.gelu(x_ref[...].astype(jnp.float32), approximate=True)
    acc = jnp.dot(xg.astype(jnp.bfloat16), w_ref[...],
                  preferred_element_type=jnp.float32)
    o_ref[...] = (acc + b_ref[...]).astype(o_ref.dtype)


def _rel_attn_kernel(q_ref, k_ref, v_ref, a_ref, m_ref, adj_ref, o_ref, *, heads):
    """All heads of one relation; relations accumulate into a resident output block.

    q_ref:   (Nd, H*D)   bf16   destination queries (lane-dense)
    k_ref:   (1, Ns, H*D) bf16  source keys for this relation
    v_ref:   (1, Ns, H*D) bf16  source values for this relation
    a_ref:   (1, H*D, H*D) bf16 block-diag per-head key transform (prior/sqrt(D) folded in)
    m_ref:   (1, H*D, H*D) bf16 block-diag per-head value transform
    adj_ref: (1, Nd, Ns) f32    dense 0/1 adjacency (dst x src)
    o_ref:   (Nd, H*D)   f32    accumulated messages for this destination type
    """
    r = pl.program_id(0)

    @pl.when(r == 0)
    def _():
        o_ref[...] = jnp.zeros_like(o_ref)

    Nd, HD = q_ref.shape
    Ns = k_ref.shape[1]
    D = HD // heads

    q = q_ref[...]                     # (Nd, HD) bf16
    k = k_ref[0]                       # (Ns, HD) bf16
    v = v_ref[0]                       # (Ns, HD) bf16
    a = a_ref[0]                       # (HD, HD) bf16
    m = m_ref[0]                       # (HD, HD) bf16

    # Wide, lane-dense per-relation transforms on the MXU (one matmul for all heads).
    kp = jnp.dot(k, a, preferred_element_type=jnp.float32).astype(jnp.bfloat16)  # (Ns, HD)
    vp = jnp.dot(v, m, preferred_element_type=jnp.float32).astype(jnp.bfloat16)  # (Ns, HD)

    mask = adj_ref[0] > 0.0            # (Nd, Ns)

    # Per-head score / softmax / PV.  heads is a small static int -> fully unrolled,
    # all ops stay 2-D (no 3-D reshapes/transposes inside the kernel).
    outs = []
    for hh in range(heads):
        sl = slice(hh * D, (hh + 1) * D)
        q_h = q[:, sl]                 # (Nd, D) bf16
        kp_h = kp[:, sl]               # (Ns, D) bf16
        vp_h = vp[:, sl]               # (Ns, D) bf16

        # Contract the last dims directly (no kp.T materialization).
        s = lax.dot_general(q_h, kp_h, (((1,), (1,)), ((), ())),
                            preferred_element_type=jnp.float32)      # (Nd, Ns) f32
        s = jnp.where(mask, s, -1e30)
        mx = jnp.max(s, axis=-1, keepdims=True)
        p = jnp.where(mask, jnp.exp(s - mx), 0.0)
        denom = jnp.sum(p, axis=-1, keepdims=True)
        inv = pl.reciprocal(jnp.maximum(denom, 1e-20), approx=True)  # EUP
        alpha = p * inv                # rows with no incoming edges -> all-zero

        outs.append(jnp.dot(alpha.astype(jnp.bfloat16), vp_h,
                            preferred_element_type=jnp.float32))     # (Nd, D) f32

    o_ref[...] += jnp.concatenate(outs, axis=-1)                     # (Nd, HD) lane-dense


# ---------------------------------------------------------------------------
# Pallas wrappers
# ---------------------------------------------------------------------------
def pallas_linear(x, w, b, *, gelu=False, row_tile=256):
    """out = (gelu(x) if gelu else x) @ w + b, row-tiled, bf16 matmul / f32 accumulate."""
    n, din = x.shape
    dout = w.shape[1]
    tn = n if n <= row_tile else row_tile

    wb = w.astype(jnp.bfloat16)
    xb = x if gelu else x.astype(jnp.bfloat16)   # gelu path keeps x in f32 for the VPU
    kernel = _gelu_linear_kernel if gelu else _linear_kernel

    return pl.pallas_call(
        kernel,
        out_shape=jax.ShapeDtypeStruct((n, dout), jnp.float32),
        grid=(pl.cdiv(n, tn),),
        in_specs=[
            pl.BlockSpec((tn, din), lambda i: (i, 0)),     # row tile of activations
            pl.BlockSpec((din, dout), lambda i: (0, 0)),   # weights resident
            pl.BlockSpec((1, dout), lambda i: (0, 0)),     # bias resident
        ],
        out_specs=pl.BlockSpec((tn, dout), lambda i: (i, 0)),
        compiler_params=pltpu.CompilerParams(dimension_semantics=("parallel",)),
    )(xb, wb, b.reshape(1, -1))


def pallas_rel_attention(q, k_stack, v_stack, a_stack, m_stack, adj_stack, heads):
    """q: (Nd, HD) bf16; k/v_stack: (R, Ns, HD) bf16; a/m_stack: (R, HD, HD) bf16;
    adj_stack: (R, Nd, Ns) f32.  Returns summed messages (Nd, HD) f32."""
    R, Ns, HD = k_stack.shape
    Nd = q.shape[0]
    kernel = functools.partial(_rel_attn_kernel, heads=heads)

    # TODO(synk): for large graphs, tile Ns with an online (flash-style) softmax and
    # add a parallel Nd-row-tile grid axis; at these tiny shapes a single block fits VMEM.
    return pl.pallas_call(
        kernel,
        out_shape=jax.ShapeDtypeStruct((Nd, HD), jnp.float32),
        grid=(R,),
        in_specs=[
            pl.BlockSpec((Nd, HD), lambda r: (0, 0)),        # q shared across relations
            pl.BlockSpec((1, Ns, HD), lambda r: (r, 0, 0)),  # k for relation r
            pl.BlockSpec((1, Ns, HD), lambda r: (r, 0, 0)),  # v for relation r
            pl.BlockSpec((1, HD, HD), lambda r: (r, 0, 0)),  # block-diag A (scale folded)
            pl.BlockSpec((1, HD, HD), lambda r: (r, 0, 0)),  # block-diag M
            pl.BlockSpec((1, Nd, Ns), lambda r: (r, 0, 0)),  # adjacency
        ],
        out_specs=pl.BlockSpec((Nd, HD), lambda r: (0, 0)),  # resident accumulator
        compiler_params=pltpu.CompilerParams(dimension_semantics=("arbitrary",)),
    )(q, k_stack, v_stack, a_stack, m_stack, adj_stack)


# ---------------------------------------------------------------------------
# Parameters (deterministic in-script init)
# ---------------------------------------------------------------------------
def _dense(key, din, dout):
    kw, kb = jax.random.split(key)
    w = jax.random.normal(kw, (din, dout), jnp.float32) * (1.0 / math.sqrt(din))
    b = jax.random.normal(kb, (dout,), jnp.float32) * 0.01
    return {"w": w, "b": b}


def init_params(key, in_dims, hidden, out_dim, heads, node_types, edge_types):
    D = hidden // heads
    keys = iter(jax.random.split(key, 128))
    params = {"lin": {}, "k": {}, "q": {}, "v": {}, "a": {}, "skip": {},
              "rel_a": {}, "rel_m": {}, "rel_p": {}}
    for nt in node_types:
        params["lin"][nt] = _dense(next(keys), in_dims[nt], hidden)
        params["k"][nt] = _dense(next(keys), hidden, hidden)
        params["q"][nt] = _dense(next(keys), hidden, hidden)
        params["v"][nt] = _dense(next(keys), hidden, hidden)
        params["a"][nt] = _dense(next(keys), hidden, hidden)
        params["skip"][nt] = jnp.float32(1.0)
    for et in edge_types:
        params["rel_a"][et] = jax.random.normal(next(keys), (heads, D, D), jnp.float32) / math.sqrt(D)
        params["rel_m"][et] = jax.random.normal(next(keys), (heads, D, D), jnp.float32) / math.sqrt(D)
        params["rel_p"][et] = jnp.ones((heads,), jnp.float32)
    params["out"] = _dense(next(keys), hidden, out_dim)
    return params


def _block_diag(mats):
    """(H, D, D) per-head matrices -> (H*D, H*D) block-diagonal matrix."""
    H, D, _ = mats.shape
    eye = jnp.eye(H, dtype=mats.dtype)
    return (eye[:, None, :, None] * mats[:, :, None, :]).reshape(H * D, H * D)


# ---------------------------------------------------------------------------
# Forward pass (HGT.forward)
# ---------------------------------------------------------------------------
def hgt_forward(params, x_dict, adj_dict, node_types, edge_types, hidden, heads):
    D = hidden // heads
    inv_sqrt_d = 1.0 / math.sqrt(D)

    # 1) per-node-type input projection (lin_dict)
    h = {nt: pallas_linear(x_dict[nt], params["lin"][nt]["w"], params["lin"][nt]["b"])
         for nt in node_types}

    # TODO(synk): HGTConv dropout_rate=0.6 is identity in eval mode; not applied here.

    # 2) fused K/Q/V projection per node type, kept in lane-dense (N, hidden) layout
    K, Q, V = {}, {}, {}
    for nt in node_types:
        w_kqv = jnp.concatenate(
            [params["k"][nt]["w"], params["q"][nt]["w"], params["v"][nt]["w"]], axis=1)
        b_kqv = jnp.concatenate(
            [params["k"][nt]["b"], params["q"][nt]["b"], params["v"][nt]["b"]], axis=0)
        p = pallas_linear(h[nt], w_kqv, b_kqv)     # (N, 3*hidden)
        K[nt] = p[:, :hidden]
        Q[nt] = p[:, hidden:2 * hidden]
        V[nt] = p[:, 2 * hidden:]

    # 3) per-destination-type attention; relations stacked on an "arbitrary" grid axis
    #    and summed into a VMEM-resident accumulator inside the kernel.
    agg = {}
    for nt in node_types:
        rels = [et for et in edge_types if et[2] == nt]
        if not rels:
            agg[nt] = jnp.zeros((h[nt].shape[0], hidden), jnp.float32)
            continue
        ns_max = max(adj_dict[et].shape[1] for et in rels)

        def pad_rows(x, rows):
            return jnp.pad(x, ((0, rows - x.shape[0]), (0, 0)))

        k_stack = jnp.stack([pad_rows(K[et[0]], ns_max) for et in rels]).astype(jnp.bfloat16)
        v_stack = jnp.stack([pad_rows(V[et[0]], ns_max) for et in rels]).astype(jnp.bfloat16)
        adj_stack = jnp.stack(
            [jnp.pad(adj_dict[et], ((0, 0), (0, ns_max - adj_dict[et].shape[1])))
             for et in rels])
        # Fold the per-head prior/sqrt(D) score scale into the key transform.
        a_stack = jnp.stack(
            [_block_diag(params["rel_a"][et]
                         * (params["rel_p"][et] * inv_sqrt_d)[:, None, None])
             for et in rels]).astype(jnp.bfloat16)
        m_stack = jnp.stack(
            [_block_diag(params["rel_m"][et]) for et in rels]).astype(jnp.bfloat16)

        agg[nt] = pallas_rel_attention(
            Q[nt].astype(jnp.bfloat16), k_stack, v_stack, a_stack, m_stack,
            adj_stack, heads)

    # 4) per-dst-type output projection a_lin(gelu(.)) + learnable skip connection
    out = {}
    for nt in node_types:
        o = pallas_linear(agg[nt], params["a"][nt]["w"], params["a"][nt]["b"], gelu=True)
        beta = jax.nn.sigmoid(params["skip"][nt])
        out[nt] = beta * o + (1.0 - beta) * h[nt]

    # 5) final classifier on the 'movie' node type
    return pallas_linear(out["movie"], params["out"]["w"], params["out"]["b"])


# ---------------------------------------------------------------------------
if __name__ == "__main__":
    hidden, heads, out_dim = 64, 8, 4
    node_types = ("movie", "director", "actor")
    edge_types = (
        ("movie", "to", "director"),
        ("director", "to", "movie"),
        ("movie", "to", "actor"),
        ("actor", "to", "movie"),
    )
    in_dims = {"movie": 32, "director": 16, "actor": 16}
    num_nodes = {"movie": 16, "director": 8, "actor": 8}

    key = jax.random.PRNGKey(0)
    kx, kadj, kp = jax.random.split(key, 3)

    x_dict = {
        nt: jax.random.normal(jax.random.fold_in(kx, i),
                              (num_nodes[nt], in_dims[nt]), jnp.float32)
        for i, nt in enumerate(node_types)
    }
    adj_dict = {}
    for i, et in enumerate(edge_types):
        src, _, dst = et
        adj_dict[et] = (
            jax.random.uniform(jax.random.fold_in(kadj, i),
                               (num_nodes[dst], num_nodes[src])) < 0.5
        ).astype(jnp.float32)

    params = init_params(kp, in_dims, hidden, out_dim, heads, node_types, edge_types)

    out = hgt_forward(params, x_dict, adj_dict, node_types, edge_types, hidden, heads)
    out = jax.block_until_ready(out)
    assert out.shape == (num_nodes["movie"], out_dim)
    assert bool(jnp.all(jnp.isfinite(out)))
    print("KERNEL_OK")
</pallas_src>

<mosaic_0001>
module attributes {stable_mosaic.version = 11 : i64} {
  func.func @_linear_kernel(%arg0: i32, %arg1: memref<16x32xbf16, #tpu.memory_space<vmem>>, %arg2: memref<32x64xbf16, #tpu.memory_space<vmem>>, %arg3: memref<1x64xf32, #tpu.memory_space<vmem>>, %arg4: memref<16x64xf32, #tpu.memory_space<vmem>>) attributes {dimension_semantics = [#tpu.dimension_semantics<parallel>], iteration_bounds = array<i64: 1>, scalar_prefetch = 0 : i64, scratch_operands = 0 : i64, tpu.core_type = #tpu.core_type<tc>, window_params = [{transform_indices = @transform_0, window_bounds = array<i64: 16, 32>}, {pipeline_mode = #tpu.pipeline_mode<synchronous>, transform_indices = @transform_1, window_bounds = array<i64: 32, 64>}, {pipeline_mode = #tpu.pipeline_mode<synchronous>, transform_indices = @transform_2, window_bounds = array<i64: 1, 64>}, {transform_indices = @transform_3, window_bounds = array<i64: 16, 64>}]} {
    %c0 = arith.constant 0 : index
    %c0_0 = arith.constant 0 : index
    %0 = vector.load %arg1[%c0, %c0_0] : memref<16x32xbf16, #tpu.memory_space<vmem>>, vector<16x32xbf16>
    %c0_1 = arith.constant 0 : index
    %c0_2 = arith.constant 0 : index
    %1 = vector.load %arg2[%c0_1, %c0_2] : memref<32x64xbf16, #tpu.memory_space<vmem>>, vector<32x64xbf16>
    %cst = arith.constant dense<0.000000e+00> : vector<16x64xf32>
    %2 = tpu.matmul %0, %1, %cst {dimension_numbers = #tpu.dot_dimension_numbers<[1], [0], [0], [1], [0, 0, 1, 1], [], []>} : vector<16x32xbf16>, vector<32x64xbf16>, vector<16x64xf32> -> vector<16x64xf32>
    %c0_3 = arith.constant 0 : index
    %c0_4 = arith.constant 0 : index
    %3 = vector.load %arg3[%c0_3, %c0_4] : memref<1x64xf32, #tpu.memory_space<vmem>>, vector<1x64xf32>
    %4 = vector.broadcast %3 : vector<1x64xf32> to vector<16x64xf32>
    %5 = arith.addf %2, %4 : vector<16x64xf32>
    %c0_5 = arith.constant 0 : index
    %c0_6 = arith.constant 0 : index
    %6 = vector.load %arg4[%c0_5, %c0_6] : memref<16x64xf32, #tpu.memory_space<vmem>>, vector<16x64xf32>
    tpu.vector_store %arg4[%c0_5, %c0_6], %5 {strides = array<i32>} : memref<16x64xf32, #tpu.memory_space<vmem>>, vector<16x64xf32>,
    return
  }
  func.func @transform_0(%arg0: i32) -> (i32, i32) {
    %c0_i32 = arith.constant 0 : i32
    %c0_i32_0 = arith.constant 0 : i32
    return %arg0, %c0_i32 : i32, i32
  }
  func.func @transform_1(%arg0: i32) -> (i32, i32) {
    %c0_i32 = arith.constant 0 : i32
    %c0_i32_0 = arith.constant 0 : i32
    %c0_i32_1 = arith.constant 0 : i32
    return %c0_i32, %c0_i32_0 : i32, i32
  }
  func.func @transform_2(%arg0: i32) -> (i32, i32) {
    %c0_i32 = arith.constant 0 : i32
    %c0_i32_0 = arith.constant 0 : i32
    %c0_i32_1 = arith.constant 0 : i32
    return %c0_i32, %c0_i32_0 : i32, i32
  }
  func.func @transform_3(%arg0: i32) -> (i32, i32) {
    %c0_i32 = arith.constant 0 : i32
    %c0_i32_0 = arith.constant 0 : i32
    return %arg0, %c0_i32 : i32, i32
  }
}

</mosaic_0001>

<bundles_post_ra>
// kernel: tpu_custom_call.1
= control target key start
LH: loop header
LB: loop body
LE: loop exit
PB: predicated region body
PF: predicated region fallthrough
CT: control target
= control target key end

     0   :  { %8 = vsyncpa [#allocation3], 0  ;;  %s308_s0 = inlined_call_operand.hbm [shape: bf16[16,32], index: 0, kind: input, shape index: {}]   ;;  %s309_s1 = inlined_call_operand.hbm [shape: bf16[32,64], index: 1, kind: input, shape index: {}]   ;;  %s310_s2 = inlined_call_operand.vmem [shape: f32[1,64], index: 2, kind: input, shape index: {}]   ;;  %s311_s3 = inlined_call_operand.hbm [shape: f32[16,64], index: 3, kind: output, shape index: {}]  }
   0x1   :  { %9 = vsyncpa [#allocation6], 0 }
   0x2   :  { %10 = vsyncpa [#allocation4], 0  ;;  %s240_s12 = smov [#allocation2]   ;;  %s168_s16 = scalar_lea.hbm %s308_s0, 128 }
   0x3   :  { %s16_s13 = sshll.u32 %s240_s12, 4  ;;  %p169_p0 = scmp.ne.s32.totalorder %s308_s0, %s168_s16  ;;  %s17_s13 = int_to_ptr.vmem [resolvable:$true] %s16_s13 }
   0x4   :  { %p172_p1 = scmp.lt.u32.totalorder %s168_s16, %s308_s0 }
   0x6   :  { %p174_p2 = pnand %p172_p1, %p169_p0 }
   0x8   :  { %177 = shalt.err (!%p174_p2)
}
   0x9   :  { %s178_s21 = scalar_lea.vmem %s17_s13, 128  ;;  %p183_p4 = scmp.lt.s32.totalorder %s17_s13, %s17_s13 }
   0xa   :  { %p179_p3 = scmp.ne.s32.totalorder %s17_s13, %s178_s21  ;;  %p184_p5 = scmp.lt.s32.totalorder %s178_s21, %s178_s21 }
   0xc   :  { %p185_p6 = por %p184_p5, %p183_p4 }
   0xe   :  { %p186_p7 = pnand %p185_p6, %p179_p3 }
  0x10   :  { %189 = shalt.err (!%p186_p7)
}
  0x11   :  { %s241_s22 = smov 64   ;;  %s242_s23 = smov 4  }
  0x12   :  { %22 = dma.hbm_to_vmem [thread:$0]  %s308_s0, 128, %s17_s13, [#allocation3], %s241_s22, %s241_s22, %s242_s23  }
  0x13   :  { %s243_s26 = smov [#allocation5]   ;;  %s190_s30 = scalar_lea.hbm %s309_s1, 256 }
  0x14   :  { %s28_s27 = sshll.u32 %s243_s26, 4  ;;  %p191_p8 = scmp.ne.s32.totalorder %s309_s1, %s190_s30  ;;  %s29_s27 = int_to_ptr.vmem [resolvable:$true] %s28_s27 }
  0x15   :  { %p194_p9 = scmp.lt.u32.totalorder %s190_s30, %s309_s1 }
  0x17   :  { %p196_p10 = pnand %p194_p9, %p191_p8 }
  0x19   :  { %199 = shalt.err (!%p196_p10)
}
  0x1a   :  { %s200_s8 = scalar_lea.vmem %s29_s27, 256  ;;  %p205_p12 = scmp.lt.s32.totalorder %s29_s27, %s29_s27 }
  0x1b   :  { %p201_p11 = scmp.ne.s32.totalorder %s29_s27, %s200_s8  ;;  %p206_p13 = scmp.lt.s32.totalorder %s200_s8, %s200_s8 }
  0x1d   :  { %p207_p0 = por %p206_p13, %p205_p12 }
  0x1f   :  { %p208_p1 = pnand %p207_p0, %p201_p11 }
  0x21   :  { %211 = shalt.err (!%p208_p1)
}
  0x22   :  { %34 = dma.hbm_to_vmem [thread:$0]  %s309_s1, 256, %s29_s27, [#allocation6], %s241_s22, %s241_s22, %s242_s23  }
  0x23   :  { %234 = dma.done.wait [#allocation3], 128  }
  0x24   :  { %235 = vsyncadd [#allocation3], 4294967168 }
  0x25   :  { %236 = dma.done.wait [#allocation6], 256  }
  0x26   :  { %237 = vsyncadd [#allocation6], 4294967040  ;;  %v244_v0 = vmov 0.0   ;;  %vm245_vm0 = vmmov 0   ;;  %v165_v1 = vld [vmem:[#allocation5] sm:$0xff]   ;;  %v166_v2 = vld [vmem:[#allocation5 + $0x8] sm:$0xff]  }
  0x27   :  { %148 = vmatprep.subr.bf16.mxu0 %v244_v0  ;;  %152 = vmatprep.mubr.msk.bf16.mxu0 %vm245_vm0, %v244_v0  ;;  %v167_v3 = vld [vmem:[#allocation2] sm:$0xff]   ;;  %vm74_vm1 = vcmask 261120   ;;  %s246_s1 = smov [#allocation7]   ;;  %vm119_vm2 = vcmask 523264  }
  0x28   :  { %149 = vmatpush3.bf16.msra.mxu0 %v165_v1  ;;  %v140_v4 = vld [vmem:[%s310_s2] ss:$0 sm:$0xff]  ;;  %s127_s12 = sshll.u32 %s246_s1, 4  ;;  %s128_s12 = int_to_ptr.vmem [resolvable:$true] %s127_s12 }
  0x29   :  { %150 = vmatprep.subr.bf16.mxu0 %v244_v0  ;;  %s212_s13 = scalar_lea.vmem %s128_s12, 256  ;;  %p217_p3 = scmp.lt.s32.totalorder %s128_s12, %s128_s12 }
  0x2a   :  { %p213_p2 = scmp.ne.s32.totalorder %s128_s12, %s212_s13  ;;  %p218_p4 = scmp.lt.s32.totalorder %s212_s13, %s212_s13 }
  0x2c   :  { %151 = vmatpush3.bf16.msra.mxu0 %v166_v2  ;;  %p219_p5 = por %p218_p4, %p217_p3 }
  0x2e   :  { %p220_p6 = pnand %p219_p5, %p213_p2 }
  0x2f   :  { %153 = vmatmul.mubr.msk.bf16.vlgmr.msra.gmra.mrb[0].mxu0 %vm74_vm1, %v167_v3 }
 0x102   :  { %v112_v5 = vpop.f32.mrb[0].mxu0 }
 0x103   :  { %v113_v6 = vadd.f32 %v140_v4, %v112_v5  ;;  %v154_v7 = vpop.f32.mrb[1].mxu0 }
 0x104   :  { %v115_v8 = vpop.f32.mrb[2].mxu0 }
 0x105   :  { %120 = vst.msk [vmem:[#allocation7] sm:$0xff] %vm119_vm2, %v113_v6  ;;  %v116_v9 = vadd.f32 %v140_v4, %v115_v8  ;;  %v155_v10 = vpop.f32.mrb[3].mxu0 }
 0x107   :  { %121 = vst.msk [vmem:[#allocation7 + $0x8] sm:$0xff] %vm119_vm2, %v116_v9 }
 0x108   :  { %223 = shalt.err (!%p220_p6)
}
 0x109   :  { %s224_s15 = scalar_lea.hbm %s311_s3, 256 }
 0x10a   :  { %p225_p7 = scmp.ne.s32.totalorder %s311_s3, %s224_s15  ;;  %p228_p8 = scmp.lt.u32.totalorder %s224_s15, %s311_s3 }
 0x10c   :  { %p230_p9 = pnand %p228_p8, %p225_p7 }
 0x10e   :  { %233 = shalt.err (!%p230_p9)
}
 0x10f   :  { %s247_s20 = smov 128   ;;  %s248_s21 = smov 8  }
 0x110   :  { %133 = dma.vmem_to_hbm [thread:$0]  %s128_s12, 256, %s311_s3, [#allocation4], %s247_s20, %s247_s20, %s248_s21  }
 0x111   :  { %238 = dma.done.wait [#allocation4], 256  }
 0x112   :  { %239 = vsyncadd [#allocation4], 4294967040 }
 0x113   :  { %137 = vsyncpa [#allocation3], 1 }
 0x114   :  { %138 = vsyncpa [#allocation6], 1 }
 0x115   :  { %139 = vsyncpa [#allocation4], 1 }

</bundles_post_ra>
